<compile_context>
chip_gen: v6e
topology: v6e:2x2x1
jax: 0.10.0
libtpu: 0.0.40
codegen_flags: <defaults>
</compile_context>

<pallas_src>
import jax
import jax.numpy as jnp
from jax.experimental import pallas as pl
from jax.experimental.pallas import tpu as pltpu


def _offdiag_kernel(x_ref, w_off_ref, b_off_ref, out_ref):
    # x_ref: (1, C_in, S)   w_off_ref: (C_out, C_in)   b_off_ref: (C_out, 1)
    x = x_ref[0]                                                # (C_in, S)
    y = jnp.dot(w_off_ref[...], x, preferred_element_type=jnp.float32)
    out_ref[0] = (y + b_off_ref[...]).astype(out_ref.dtype)


def _diag_offdiag_kernel(mask_ref, x_ref, w_off_ref, b_off_ref,
                         w_diag_ref, b_diag_ref, out_ref):
    # mask_ref: (1, S) with 1 at diagonal spatial positions, 0 elsewhere.
    x = x_ref[0]                                                # (C_in, S)
    y_off = jnp.dot(w_off_ref[...], x,
                    preferred_element_type=jnp.float32) + b_off_ref[...]
    y_diag = jnp.dot(w_diag_ref[...], x,
                     preferred_element_type=jnp.float32) + b_diag_ref[...]
    out_ref[0] = (y_off + mask_ref[...] * y_diag).astype(out_ref.dtype)


def _pick_tile_rows(n, c_in, c_out, dtype, *, prefer_split=False,
                    vmem_budget_bytes=24 * 1024 * 1024):
    """Largest row-tile whose lane dim (r*n) is 128-aligned and fits VMEM."""
    itemsize = jnp.dtype(dtype).itemsize
    cin_p = -(-c_in // 8) * 8
    cout_p = -(-c_out // 8) * 8
    # per grid step: double-buffered in/out blocks + f32 intermediates.
    per_row = (2 * cin_p + 3 * cout_p) * n * itemsize
    max_rows = max(1, vmem_budget_bytes // per_row)

    candidates = [r for r in range(1, n + 1)
                  if n % r == 0 and (r * n) % 128 == 0]
    if not candidates:
        return n  # full-extent block is always a legal BlockSpec
    fitting = [r for r in candidates if r <= max_rows]
    if prefer_split and len(fitting) > 1:
        # make sure >=2 parallel grid steps exist even when batch == 1
        fitting = [r for r in fitting if r < n] or fitting
    return max(fitting) if fitting else min(candidates)


def diag_offdiag_mlp(x_nchw, w_off, b_off, w_diag=None, b_diag=None, *,
                     seperate_diag=True, tile_rows=None,
                     vmem_limit_bytes=48 * 1024 * 1024):
    """x_nchw: (B, C_in, N, N).  Weights in PyTorch conv layout (C_out, C_in)
    (1x1 kernel dims squeezed), biases (C_out,).  Returns (B, C_out, N, N)."""
    B, c_in, N, N2 = x_nchw.shape
    assert N == N2
    c_out, c_in_w = w_off.shape
    assert c_in_w == c_in

    x_flat = x_nchw.reshape(B, c_in, N * N)          # free reshape (NCHW)
    b_off2 = b_off.reshape(c_out, 1)

    if tile_rows is None:
        tile_rows = _pick_tile_rows(N, c_in, c_out, x_nchw.dtype,
                                    prefer_split=(B < 2))
    assert N % tile_rows == 0
    S = tile_rows * N
    T = N // tile_rows
    grid = (T, B)                                    # batch fastest -> mask/weights stay resident

    x_spec = pl.BlockSpec((1, c_in, S), lambda t, b: (b, 0, t))
    o_spec = pl.BlockSpec((1, c_out, S), lambda t, b: (b, 0, t))
    w_spec = pl.BlockSpec((c_out, c_in), lambda t, b: (0, 0))
    b_spec = pl.BlockSpec((c_out, 1), lambda t, b: (0, 0))

    cp = pltpu.CompilerParams(
        dimension_semantics=("parallel", "parallel"),
        vmem_limit_bytes=vmem_limit_bytes)

    if seperate_diag:
        mask = jnp.eye(N, dtype=x_nchw.dtype).reshape(1, N * N)
        m_spec = pl.BlockSpec((1, S), lambda t, b: (0, t))
        b_diag2 = b_diag.reshape(c_out, 1)
        out_flat = pl.pallas_call(
            _diag_offdiag_kernel,
            out_shape=jax.ShapeDtypeStruct((B, c_out, N * N), x_nchw.dtype),
            grid_spec=pltpu.PrefetchScalarGridSpec(
                num_scalar_prefetch=0, grid=grid,
                in_specs=[m_spec, x_spec, w_spec, b_spec, w_spec, b_spec],
                out_specs=o_spec),
            compiler_params=cp,
        )(mask, x_flat, w_off, b_off2, w_diag, b_diag2)
    else:
        out_flat = pl.pallas_call(
            _offdiag_kernel,
            out_shape=jax.ShapeDtypeStruct((B, c_out, N * N), x_nchw.dtype),
            grid_spec=pltpu.PrefetchScalarGridSpec(
                num_scalar_prefetch=0, grid=grid,
                in_specs=[x_spec, w_spec, b_spec],
                out_specs=o_spec),
            compiler_params=cp,
        )(x_flat, w_off, b_off2)

    return out_flat.reshape(B, c_out, N, N)


def _reference(x_nchw, w_off, b_off, w_diag, b_diag, seperate_diag):
    # Pure-JAX reference mirroring the PyTorch forward (weights (C_out, C_in)).
    y = jnp.einsum('oc,bcij->boij', w_off, x_nchw) + b_off[None, :, None, None]
    if seperate_diag:
        diag_x = jnp.einsum('bcii->bci', x_nchw)          # x.diagonal(dim1=2, dim2=3)
        yd = jnp.einsum('oc,bci->boi', w_diag, diag_x) + b_diag[None, :, None]
        eye = jnp.eye(x_nchw.shape[-1], dtype=x_nchw.dtype)
        y = y + yd[:, :, :, None] * eye[None, None, :, :]  # diag_embed
    return y


if __name__ == "__main__":
    key = jax.random.PRNGKey(0)
    kx, kw1, kb1, kw2, kb2, kx2 = jax.random.split(key, 6)

    # Deterministic synthetic params (Conv2d/Conv1d with kernel size 1 collapse
    # to (C_out, C_in) weight matrices).
    B, C_IN, C_OUT, N = 2, 4, 8, 16
    bound = 1.0 / (C_IN ** 0.5)
    x = jax.random.normal(kx, (B, C_IN, N, N), dtype=jnp.float32)
    w_off = jax.random.uniform(kw1, (C_OUT, C_IN), jnp.float32, -bound, bound)
    b_off = jax.random.uniform(kb1, (C_OUT,), jnp.float32, -bound, bound)
    w_diag = jax.random.uniform(kw2, (C_OUT, C_IN), jnp.float32, -bound, bound)
    b_diag = jax.random.uniform(kb2, (C_OUT,), jnp.float32, -bound, bound)

    # seperate_diag = True path
    out = jax.block_until_ready(
        diag_offdiag_mlp(x, w_off, b_off, w_diag, b_diag, seperate_diag=True))
    ref = _reference(x, w_off, b_off, w_diag, b_diag, True)
    assert out.shape == (B, C_OUT, N, N)
    assert jnp.allclose(out, ref, atol=1e-5, rtol=1e-5)

    # seperate_diag = False path
    out2 = jax.block_until_ready(
        diag_offdiag_mlp(x, w_off, b_off, seperate_diag=False))
    ref2 = _reference(x, w_off, b_off, None, None, False)
    assert jnp.allclose(out2, ref2, atol=1e-5, rtol=1e-5)

    # Multi-tile spatial grid: N=32, tile_rows=4 -> 8 row tiles x 3 batches.
    B2, N2 = 3, 32
    x2 = jax.random.normal(kx2, (B2, C_IN, N2, N2), dtype=jnp.float32)
    out3 = jax.block_until_ready(
        diag_offdiag_mlp(x2, w_off, b_off, w_diag, b_diag,
                         seperate_diag=True, tile_rows=4))
    ref3 = _reference(x2, w_off, b_off, w_diag, b_diag, True)
    assert jnp.allclose(out3, ref3, atol=1e-5, rtol=1e-5)

    print("KERNEL_OK")
</pallas_src>

<mosaic_0001>
module attributes {stable_mosaic.version = 11 : i64} {
  func.func @_diag_offdiag_kernel(%arg0: i32, %arg1: i32, %arg2: memref<1x256xf32, #tpu.memory_space<vmem>>, %arg3: memref<1x4x256xf32, #tpu.memory_space<vmem>>, %arg4: memref<8x4xf32, #tpu.memory_space<vmem>>, %arg5: memref<8x1xf32, #tpu.memory_space<vmem>>, %arg6: memref<8x4xf32, #tpu.memory_space<vmem>>, %arg7: memref<8x1xf32, #tpu.memory_space<vmem>>, %arg8: memref<1x8x256xf32, #tpu.memory_space<vmem>>) attributes {dimension_semantics = [#tpu.dimension_semantics<parallel>, #tpu.dimension_semantics<parallel>], iteration_bounds = array<i64: 1, 2>, scalar_prefetch = 0 : i64, scratch_operands = 0 : i64, tpu.core_type = #tpu.core_type<tc>, window_params = [{transform_indices = @transform_0, window_bounds = array<i64: 1, 256>}, {transform_indices = @transform_1, window_bounds = array<i64: 1, 4, 256>}, {pipeline_mode = #tpu.pipeline_mode<synchronous>, transform_indices = @transform_2, window_bounds = array<i64: 8, 4>}, {pipeline_mode = #tpu.pipeline_mode<synchronous>, transform_indices = @transform_3, window_bounds = array<i64: 8, 1>}, {pipeline_mode = #tpu.pipeline_mode<synchronous>, transform_indices = @transform_4, window_bounds = array<i64: 8, 4>}, {pipeline_mode = #tpu.pipeline_mode<synchronous>, transform_indices = @transform_5, window_bounds = array<i64: 8, 1>}, {transform_indices = @transform_6, window_bounds = array<i64: 1, 8, 256>}]} {
    %c0 = arith.constant 0 : index
    %c0_0 = arith.constant 0 : index
    %c0_1 = arith.constant 0 : index
    %0 = vector.load %arg3[%c0, %c0_0, %c0_1] : memref<1x4x256xf32, #tpu.memory_space<vmem>>, vector<1x4x256xf32>
    %1 = vector.shape_cast %0 : vector<1x4x256xf32> to vector<4x256xf32>
    %c0_2 = arith.constant 0 : index
    %c0_3 = arith.constant 0 : index
    %2 = vector.load %arg4[%c0_2, %c0_3] : memref<8x4xf32, #tpu.memory_space<vmem>>, vector<8x4xf32>
    %cst = arith.constant dense<0.000000e+00> : vector<8x256xf32>
    %3 = tpu.matmul %2, %1, %cst {dimension_numbers = #tpu.dot_dimension_numbers<[1], [0], [0], [1], [0, 0, 1, 1], [], []>} : vector<8x4xf32>, vector<4x256xf32>, vector<8x256xf32> -> vector<8x256xf32>
    %c0_4 = arith.constant 0 : index
    %c0_5 = arith.constant 0 : index
    %4 = vector.load %arg5[%c0_4, %c0_5] : memref<8x1xf32, #tpu.memory_space<vmem>>, vector<8x1xf32>
    %5 = vector.broadcast %4 : vector<8x1xf32> to vector<8x256xf32>
    %6 = arith.addf %3, %5 : vector<8x256xf32>
    %c0_6 = arith.constant 0 : index
    %c0_7 = arith.constant 0 : index
    %7 = vector.load %arg6[%c0_6, %c0_7] : memref<8x4xf32, #tpu.memory_space<vmem>>, vector<8x4xf32>
    %cst_8 = arith.constant dense<0.000000e+00> : vector<8x256xf32>
    %8 = tpu.matmul %7, %1, %cst_8 {dimension_numbers = #tpu.dot_dimension_numbers<[1], [0], [0], [1], [0, 0, 1, 1], [], []>} : vector<8x4xf32>, vector<4x256xf32>, vector<8x256xf32> -> vector<8x256xf32>
    %c0_9 = arith.constant 0 : index
    %c0_10 = arith.constant 0 : index
    %9 = vector.load %arg7[%c0_9, %c0_10] : memref<8x1xf32, #tpu.memory_space<vmem>>, vector<8x1xf32>
    %10 = vector.broadcast %9 : vector<8x1xf32> to vector<8x256xf32>
    %11 = arith.addf %8, %10 : vector<8x256xf32>
    %c0_11 = arith.constant 0 : index
    %c0_12 = arith.constant 0 : index
    %12 = vector.load %arg2[%c0_11, %c0_12] : memref<1x256xf32, #tpu.memory_space<vmem>>, vector<1x256xf32>
    %13 = vector.broadcast %12 : vector<1x256xf32> to vector<8x256xf32>
    %14 = arith.mulf %13, %11 : vector<8x256xf32>
    %15 = arith.addf %6, %14 : vector<8x256xf32>
    %c0_13 = arith.constant 0 : index
    %c0_14 = arith.constant 0 : index
    %c0_15 = arith.constant 0 : index
    %16 = vector.load %arg8[%c0_13, %c0_14, %c0_15] : memref<1x8x256xf32, #tpu.memory_space<vmem>>, vector<1x8x256xf32>
    %17 = vector.shape_cast %16 : vector<1x8x256xf32> to vector<8x256xf32>
    %18 = vector.shape_cast %15 : vector<8x256xf32> to vector<1x8x256xf32>
    tpu.vector_store %arg8[%c0_13, %c0_14, %c0_15], %18 {strides = array<i32>} : memref<1x8x256xf32, #tpu.memory_space<vmem>>, vector<1x8x256xf32>,
    return
  }
  func.func @transform_0(%arg0: i32, %arg1: i32) -> (i32, i32) {
    %c0_i32 = arith.constant 0 : i32
    %c0_i32_0 = arith.constant 0 : i32
    return %c0_i32, %arg0 : i32, i32
  }
  func.func @transform_1(%arg0: i32, %arg1: i32) -> (i32, i32, i32) {
    %c0_i32 = arith.constant 0 : i32
    %c0_i32_0 = arith.constant 0 : i32
    return %arg1, %c0_i32, %arg0 : i32, i32, i32
  }
  func.func @transform_2(%arg0: i32, %arg1: i32) -> (i32, i32) {
    %c0_i32 = arith.constant 0 : i32
    %c0_i32_0 = arith.constant 0 : i32
    %c0_i32_1 = arith.constant 0 : i32
    return %c0_i32, %c0_i32_0 : i32, i32
  }
  func.func @transform_3(%arg0: i32, %arg1: i32) -> (i32, i32) {
    %c0_i32 = arith.constant 0 : i32
    %c0_i32_0 = arith.constant 0 : i32
    %c0_i32_1 = arith.constant 0 : i32
    return %c0_i32, %c0_i32_0 : i32, i32
  }
  func.func @transform_4(%arg0: i32, %arg1: i32) -> (i32, i32) {
    %c0_i32 = arith.constant 0 : i32
    %c0_i32_0 = arith.constant 0 : i32
    %c0_i32_1 = arith.constant 0 : i32
    return %c0_i32, %c0_i32_0 : i32, i32
  }
  func.func @transform_5(%arg0: i32, %arg1: i32) -> (i32, i32) {
    %c0_i32 = arith.constant 0 : i32
    %c0_i32_0 = arith.constant 0 : i32
    %c0_i32_1 = arith.constant 0 : i32
    return %c0_i32, %c0_i32_0 : i32, i32
  }
  func.func @transform_6(%arg0: i32, %arg1: i32) -> (i32, i32, i32) {
    %c0_i32 = arith.constant 0 : i32
    %c0_i32_0 = arith.constant 0 : i32
    return %arg1, %c0_i32, %arg0 : i32, i32, i32
  }
}

</mosaic_0001>

<bundles_post_ra>
// kernel: tpu_custom_call.1
= control target key start
LH: loop header
LB: loop body
LE: loop exit
PB: predicated region body
PF: predicated region fallthrough
CT: control target
= control target key end

     0   :  { %11 = vsyncpa [#allocation3], 0  ;;  %s905_s0 = inlined_call_operand.vmem [shape: f32[1,256], index: 0, kind: input, shape index: {}]   ;;  %s906_s1 = inlined_call_operand.vmem [shape: f32[2,4,256], index: 1, kind: input, shape index: {}]   ;;  %s907_s2 = inlined_call_operand.vmem [shape: f32[8,4], index: 2, kind: input, shape index: {}]   ;;  %s908_s3 = inlined_call_operand.vmem [shape: f32[8,1], index: 3, kind: input, shape index: {}]   ;;  %s909_s4 = inlined_call_operand.vmem [shape: f32[8,4], index: 4, kind: input, shape index: {}]   ;;  %s910_s5 = inlined_call_operand.vmem [shape: f32[8,1], index: 5, kind: input, shape index: {}]   ;;  %s911_s6 = inlined_call_operand.hbm [shape: f32[2,8,256], index: 6, kind: output, shape index: {}]  }
   0x1   :  { %13 = vsyncpa [#allocation3 + $0x1], 0  ;;  %s791_s21 = smov 0   ;;  %s793_s22 = smov 0  }
   0x2   :  { %s795_s23 = smov 0   ;;  %s797_s24 = smov 0  }
   0x3   :  { %s799_s25 = smov 0   ;;  %s801_s26 = smov 0  }
   0x4 LB: > { %s594_s27 = sadd.s32 4294967295, %s751_s26   ;;  %s595_s28 = sadd.s32 4294967294, %s751_s26   ;;  %s751_s26 = sphi %s801_s26, %s19_s26   ;;  %s747_s25 = sphi %s799_s25, %s918_s25   ;;  %s743_s24 = sphi %s797_s24, %s917_s24   ;;  %s739_s23 = sphi %s795_s23, %s916_s23   ;;  %s735_s22 = sphi %s793_s22, %s915_s22   ;;  %s731_s21 = sphi %s791_s21, %s914_s21  }
   0x5   : > { %s28_s29 = sadd.s32 1, %s747_s25  ;;  %s178_s30 = sadd.s32 1, %s739_s23 }
   0x6   : > { %p29_p0 = scmp.ge.s32.totalorder %s28_s29, 2  ;;  %p188_p1 = scmp.ne.s32.totalorder %s739_s23, %s735_s22 }
   0x7   : > { %p189_p2 = scmp.eq.s32.totalorder %s594_s27, 1  ;;  %p194_p3 = scmp.ne.s32.totalorder %s735_s22, %s731_s21 }
   0x8   : > { %s920_s29 = smov (%p29_p0, %s28_s29), 0  ;;  %p195_p5 = scmp.eq.s32.totalorder %s595_s28, 1 }
   0x9   : > { %p831_p4 = por %p189_p2, %p188_p1  ;;  %s173_s8 = ssub.s32 %s747_s25, %s920_s29 }
   0xa   : > { %p599_p6 = scmp.ge.s32.totalorder %s751_s26, 1  ;;  %p176_p7 = scmp.eq.s32.totalorder %s173_s8, 0 }
   0xb   : > { %p838_p8 = por %p195_p5, %p194_p3  ;;  %p246_p9 = scmp.lt.s32.totalorder %s751_s26, 3 }
   0xc   : > { %s844_s10 = scalar_select %p176_p7, %s739_s23, %s178_s30  }
   0xd   : > { %p247_p10 = pnand %p599_p6, %p246_p9 }
   0xe   : > { %p290_p11 = scmp.lt.s32.totalorder (!%p247_p10), %s743_s24, 1  ;;  %s281_s8 = sand.u32 (!%p247_p10), 1, %s735_s22  }
   0xf   : > { %250 = sbr.rel (%p247_p10) target bundleno = 244 (0xf4), region = 44  ;;  %s490_s20 = scalar_lea.sflag (!%p247_p10), [#allocation3], %s281_s8 }
  0x14   : > { %v753_v0 = vmov 0.0   ;;  %v391_v1 = vld [vmem:[%s910_s5] sm:$0xff]  ;;  %s291_s13 = scalar_select %p290_p11, %s743_s24, 1  ;;  %v754_v2 = vmov 0   ;;  %vm314_vm0 = vcmask 1043456   ;;  %vm310_vm1 = vcmask 31744  }
  0x15   : > { %383 = vmatprep.mubr.f32.mxu0 %v753_v0  ;;  %464 = vmatprep.mubr.f32.mxu1 %v753_v0  ;;  %v302_v3 = vld [vmem:[%s908_s3] sm:$0xff]  ;;  %v473_v8 = vlaneseq }
  0x16   : > { %673 = vset.pattern.permute.xlu0 %v754_v2  ;;  %s614_s14 = sshll.u32 %s291_s13, 3  ;;  %v301_v6 = vld [vmem:[%s907_s2] sm:$0xff]  ;;  %s600_s13 = sshll.u32 %s281_s8, 4 }
  0x17   : > { %394 = vperm.xlu0 %673, %v391_v1   ;;  %s297_s19 = scalar_lea.vmem %s906_s1, %s614_s14  ;;  %v390_v7 = vld [vmem:[%s909_s4] sm:$0xff]  ;;  %v474_v9 = vshrl.u32 %v473_v8, 7  ;;  %s615_s14 = sshll.u32 %s743_s24, 8 }
  0x18   : > { %v300_v4 = vld [vmem:[%s297_s19] sm:$0xff]  ;;  %s283_s15 = scalar_lea.vmem [#allocation2], %s600_s13  ;;  %s504_s19 = scalar_lea.hbm %s911_s6, %s615_s14 }
  0x19   : > { %v309_v5 = vcombine.high %v300_v4, %v300_v4  ;;  %v475_v11 = vsub.s32 0, %v474_v9  ;;  %v471_v12 = vld [vmem:[%s905_s0] sm:$0x3]  ;;  %v479_v13 = vsub.s32 1, %v474_v9  ;;  %s506_s16 = sshll.u32 %s283_s15, 4  ;;  %s755_s24 = smov [#allocation2]   ;;  %s507_s16 = int_to_ptr.vmem [resolvable:$true] %s506_s16 }
  0x1a   : > { %s675_s27 = scalar_lea.vmem %s507_s16, 256  ;;  %s679_s28 = sshll.u32 %s755_s24, 4  ;;  %s680_s28 = int_to_ptr.vmem [resolvable:$false] %s679_s28 }
  0x1b   : > { %305 = vperm.xlu0 %673, %v302_v3   ;;  %603 = vmatprep.subr.msk.mxu0 %vm314_vm0, %v309_v5  ;;  %v476_v15 = vrot.slane %v471_v12, %v475_v11  ;;  %v480_v19 = vrot.slane %v471_v12, %v479_v13  ;;  %p676_p12 = scmp.ne.s32.totalorder %s507_s16, %s675_s27  ;;  %s681_s30 = scalar_lea.vmem %s680_s28, 512 }
  0x1c   : > { %606 = vmatprep.subr.msk.mxu1 %vm314_vm0, %v309_v5  ;;  %604 = vmatpush1.msk.msra.mxu0 %vm314_vm0, %v300_v4  ;;  %p682_p1 = scmp.lt.s32.totalorder %s507_s16, %s680_s28  ;;  %p683_p2 = scmp.lt.s32.totalorder %s681_s30, %s675_s27 }
  0x1d   : > { %607 = vmatpush1.msk.msra.mxu1 %vm314_vm0, %v300_v4  ;;  %605 = vmatmul.mubr.msk.f32.vlgmr.msra.gmra.mxu0 %vm310_vm1, %v301_v6  ;;  %p677_p13 = pnand %p676_p12, %p831_p4 }
  0x1e   : > { %608 = vmatmul.mubr.msk.f32.vlgmr.msra.gmra.mxu1 %vm310_vm1, %v390_v7  ;;  %p684_p3 = por %p683_p2, %p682_p1 }
  0x1f   : > { %p678_p0 = pneg %p677_p13 }
  0x21   : > { %p685_p5 = pnand %p684_p3, %p678_p0 }
  0x92   : > { %v395_v10 = vpop.permute.xlu0 %394 }
  0x96   : > { %v306_v14 = vpop.permute.xlu0 %305 }
  0xdd   : > { %v385_v16 = vpop.f32.mrf.mxu0 }
  0xde   : > { %v466_v17 = vpop.f32.mrf.mxu1  ;;  %v386_v22 = vadd.f32 %v385_v16, %v306_v14 }
  0xdf   : > { %v467_v18 = vadd.f32 %v466_v17, %v395_v10  ;;  %v387_v20 = vpop.f32.mrf.mxu0 }
  0xe0   : > { %v468_v21 = vpop.f32.mrf.mxu1  ;;  %v388_v26 = vadd.f32 %v387_v20, %v306_v14 }
  0xe1   : > { %v483_v23 = vmul.f32 %v476_v15, %v467_v18  ;;  %v469_v24 = vadd.f32 %v468_v21, %v395_v10 }
  0xe3   : > { %v485_v25 = vadd.f32 %v483_v23, %v386_v22  ;;  %v484_v27 = vmul.f32 %v480_v19, %v469_v24 }
  0xe5   : > { %v486_v28 = vadd.f32 %v484_v27, %v388_v26  ;;  %487 = vst [vmem:[%s283_s15] sm:$0xff] %v485_v25 }
  0xe7   : > { %488 = vst [vmem:[%s283_s15 + $0x8] sm:$0xff] %v486_v28 }
  0xe8   : > { %688 = shalt.err (!%p685_p5)
}
  0xe9   : > { %s689_s11 = scalar_lea.hbm %s504_s19, 256  ;;  %s693_s13 = scalar_lea.hbm %s911_s6, 512 }
  0xea   : > { %p690_p6 = scmp.ne.s32.totalorder %s504_s19, %s689_s11  ;;  %p694_p10 = scmp.lt.s32.totalorder %s504_s19, %s911_s6 }
  0xeb   : > { %p695_p11 = scmp.lt.s32.totalorder %s693_s13, %s689_s11 }
  0xec   : > { %p691_p7 = pnand %p690_p6, %p831_p4 }
  0xed   : > { %p696_p12 = por %p695_p11, %p694_p10 }
  0xee   : > { %p692_p9 = pneg %p691_p7 }
  0xf0   : > { %p697_p13 = pnand %p696_p12, %p692_p9 }
  0xf2   : > { %700 = shalt.err (!%p697_p13)
}
  0xf3   : > { %616 = dma.vmem_to_hbm [thread:$0]  (%p831_p4), %s507_s16, 256, %s504_s19, %s490_s20  }
  0xf4 PF: > { %p622_p0 = scmp.ge.s32.totalorder %s751_s26, 2  ;;  %s518_s17 = sand.u32 1, %s731_s21  }
  0xf5   : > { %s519_s18 = scalar_lea.sflag [#allocation3], %s518_s17 }
  0xf6   : > { %p619_p1 = pnand %p622_p0, %p838_p8 }
  0xf8   : > { %p620_p2 = pneg %p619_p1 }
  0xfa   : > { %726 = dma.done.wait (%p620_p2), %s519_s18, 256  }
  0xfb   : > { %728 = vsyncadd (%p620_p2), %s519_s18, 4294967040  ;;  %s19_s26 = sadd.s32 1, %s751_s26   ;;  %s914_s21 = smov %s735_s22 }
  0xfc   : > { %p16_p3 = scmp.ge.s32.totalorder %s19_s26, 4   ;;  %s915_s22 = smov %s739_s23 }
  0xfd   : > { %s916_s23 = smov %s844_s10  ;;  %s917_s24 = smov %s747_s25 }
  0xfe   : > { %s918_s25 = smov %s920_s29  ;;  %18 = sbr.rel (!%p16_p3) target bundleno = 4 (0x4), region = 82 }
 0x103   :  { %524 = vsyncpa [#allocation3], 1 }
 0x104   :  { %526 = vsyncpa [#allocation3 + $0x1], 1 }

</bundles_post_ra>
